<compile_context>
chip_gen: v6e
topology: v6e:2x2x1
jax: 0.10.0
libtpu: 0.0.40
codegen_flags: <defaults>
</compile_context>

<pallas_src>
import jax
import jax.numpy as jnp
from jax.experimental import pallas as pl
from jax.experimental.pallas import tpu as pltpu


def _round_up(x, m):
    return ((x + m - 1) // m) * m


def _cdiv(a, b):
    return (a + b - 1) // b


# ----------------------------------------------------------------------------
# Pallas kernel: per (row tile i, vocab tile j)
#   j == 0:  z = relu(hidden_i @ W_fused + b1)        cached in VMEM scratch
#   all j :  out[i, j] = z @ W2[:, j] + b2[j]
# ----------------------------------------------------------------------------
def fused_adapter_kernel(h_ref, wf_ref, b1_ref, w2_ref, b2_ref, o_ref, z_ref):
    # h_ref : (TM, D)  bf16 hidden tile (resident across the V axis)
    # wf_ref: (D, H)   bf16 W_fused = lm_head @ W1 (resident)
    # b1_ref: (1, H)   f32
    # w2_ref: (H, TV)  bf16 adapter W2 vocab tile
    # b2_ref: (1, TV)  f32
    # o_ref : (TM, TV) bf16 adapted-logits tile
    # z_ref : (TM, H)  bf16 scratch: relu(hidden @ W_fused + b1), reused over j
    @pl.when(pl.program_id(1) == 0)
    def _():
        z = jnp.dot(h_ref[...], wf_ref[...],
                    preferred_element_type=jnp.float32)      # MXU, f32 acc
        z_ref[...] = jnp.maximum(z + b1_ref[...], 0.0).astype(z_ref.dtype)

    y = jnp.dot(z_ref[...], w2_ref[...],
                preferred_element_type=jnp.float32) + b2_ref[...]
    o_ref[...] = y.astype(o_ref.dtype)


# ----------------------------------------------------------------------------
# VMEM footprint model & chip-aware tile selection
# ----------------------------------------------------------------------------
def _vmem_capacity_bytes():
    # Pure hardware query; conservative (v7x) fallback if the info API differs.
    try:
        cap = getattr(pltpu.get_tpu_info(), "vmem_capacity_bytes", None)
        if cap:
            return int(cap)
    except Exception:
        pass
    return 64 << 20


def _footprint_bytes(tm, tv, d_model, h_dim):
    """Per-step VMEM need: double-buffered tiles + scratch + in-body intermediates."""
    bf16, f32 = 2, 4
    h_lanes = _round_up(h_dim, 128)                # (.., H) pads to 128 lanes
    total = 0
    total += 2 * tm * d_model * bf16               # hidden tile (double-buffered)
    total += 2 * d_model * h_lanes * bf16          # W_fused (resident, worst case 2 bufs)
    total += 2 * 8 * h_lanes * f32                 # b1 (1,H) -> (8,128) padded
    total += 2 * h_dim * tv * bf16                 # W2 vocab tile
    total += 2 * 8 * tv * f32                      # b2 vocab tile
    total += 2 * tm * tv * bf16                    # output tile
    total += tm * h_lanes * bf16                   # z scratch
    total += tm * h_lanes * f32                    # f32 z before relu/cast
    total += tm * tv * f32                         # f32 y before cast to bf16
    return total


def _select_tiles(m16, v128, d_model, h_dim, budget):
    # Row tiling: big tiles (amortize ~0.35us/step), minimal padding waste, and
    # >= 2 row tiles for large M so the v7x megacore can shard the M axis.
    n_m = _cdiv(m16, 512)
    if n_m < 2 and m16 >= 256:
        n_m = 2
    tm = _round_up(_cdiv(m16, n_m), 16)

    tv = min(v128, 2048)                           # lane-dense, multiple of 128
    while _footprint_bytes(tm, tv, d_model, h_dim) > budget:
        if tv > 128:
            tv = max(128, _round_up(tv // 2, 128))
        elif tm > 16:
            tm = max(16, _round_up(tm // 2, 16))
        else:
            break                                  # estimate is conservative; proceed

    # Rebalance so the last vocab/row tile is not mostly padding.
    n_v = _cdiv(v128, tv)
    tv = _round_up(_cdiv(v128, n_v), 128)
    n_m = _cdiv(m16, tm)
    tm = _round_up(_cdiv(m16, n_m), 16)
    return tm, n_m, tv, n_v


def _build_fused_call(m_pad, tm, n_m, v_pad, tv, n_v, d_model, h_dim, out_dtype,
                      vmem_limit, cost):
    return pl.pallas_call(
        fused_adapter_kernel,
        out_shape=jax.ShapeDtypeStruct((m_pad, v_pad), out_dtype),
        grid_spec=pltpu.PrefetchScalarGridSpec(
            num_scalar_prefetch=0,
            grid=(n_m, n_v),                                   # V innermost
            in_specs=[
                pl.BlockSpec((tm, d_model), lambda i, j: (i, 0)),   # hidden
                pl.BlockSpec((d_model, h_dim), lambda i, j: (0, 0)),  # W_fused
                pl.BlockSpec((1, h_dim), lambda i, j: (0, 0)),      # b1 (f32)
                pl.BlockSpec((h_dim, tv), lambda i, j: (0, j)),     # W2 tile
                pl.BlockSpec((1, tv), lambda i, j: (0, j)),         # b2 tile (f32)
            ],
            out_specs=pl.BlockSpec((tm, tv), lambda i, j: (i, j)),
            scratch_shapes=[pltpu.VMEM((tm, h_dim), jnp.bfloat16)],  # z cache
        ),
        compiler_params=pltpu.CompilerParams(
            # M axis sharded across TensorCores; V axis must stay sequential per
            # core because the z scratch is filled at j == 0.
            dimension_semantics=("parallel", "arbitrary"),
            vmem_limit_bytes=vmem_limit,
        ),
        cost_estimate=cost,
    )


def fused_adapter_forward(hidden, lm_head, w1, b1, w2, b2, *,
                          compute_dtype=jnp.bfloat16,
                          out_dtype=jnp.bfloat16):
    """adapted_logits = relu((hidden @ lm_head) @ W1 + b1) @ W2 + b2, via Pallas.

    The lm_head is pre-fused algebraically: (h @ lm_head) @ W1 == h @ (lm_head @ W1).
    """
    B, S, D = hidden.shape
    V = w2.shape[1]
    H = w1.shape[1]
    M = B * S

    # One-time tiny [D, H] fused weight, computed in f32 by XLA outside the kernel.
    w_fused = jnp.dot(lm_head.astype(jnp.float32), w1.astype(jnp.float32))

    m16 = _round_up(M, 16)                          # bf16 sublane packing
    v128 = _round_up(V, 128)                        # lane-dense output tiles

    capacity = _vmem_capacity_bytes()
    budget = int((capacity - (8 << 20)) * 0.9)      # leave headroom for compiler
    tm, n_m, tv, n_v = _select_tiles(m16, v128, D, H, budget)
    m_pad = n_m * tm
    v_pad = n_v * tv

    # Always set the scoped-VMEM limit (v5e defaults to 16 MiB) and clamp it
    # below physical capacity.
    vmem_limit = int(_footprint_bytes(tm, tv, D, H) * 1.4) + (2 << 20)
    vmem_limit = min(max(vmem_limit, 32 << 20), capacity - (4 << 20))

    x = hidden.reshape(M, D).astype(compute_dtype)
    if m_pad != M:
        x = jnp.pad(x, ((0, m_pad - M), (0, 0)))

    w2c = w2.astype(compute_dtype)
    b2c = b2.reshape(1, V).astype(jnp.float32)
    if v_pad != V:
        w2c = jnp.pad(w2c, ((0, 0), (0, v_pad - V)))
        b2c = jnp.pad(b2c, ((0, 0), (0, v_pad - V)))

    cost = pl.CostEstimate(
        flops=2 * m_pad * D * H + 2 * m_pad * H * v_pad,
        transcendentals=0,
        bytes_accessed=(m_pad * D + D * H + H * v_pad + m_pad * v_pad) * 2
                       + (H + v_pad) * 4,
    )

    out = _build_fused_call(m_pad, tm, n_m, v_pad, tv, n_v, D, H, out_dtype,
                            vmem_limit, cost)(
        x,
        w_fused.astype(compute_dtype),
        b1.reshape(1, H).astype(jnp.float32),
        w2c,
        b2c,
    )
    return out[:M, :V].reshape(B, S, V)


# ----------------------------------------------------------------------------
# Deterministic parameter init (PyTorch nn.Linear default: U(-1/sqrt(fan_in), +))
# ----------------------------------------------------------------------------
def init_adapter_params(key, vocab_size, hidden=32, dtype=jnp.float32):
    k1, k2, k3, k4 = jax.random.split(key, 4)
    bound1 = 1.0 / float(vocab_size) ** 0.5
    bound2 = 1.0 / float(hidden) ** 0.5
    # stored as [in, out] (transposed vs. PyTorch)
    w1 = jax.random.uniform(k1, (vocab_size, hidden), dtype, -bound1, bound1)
    b1 = jax.random.uniform(k2, (hidden,), dtype, -bound1, bound1)
    w2 = jax.random.uniform(k3, (hidden, vocab_size), dtype, -bound2, bound2)
    b2 = jax.random.uniform(k4, (vocab_size,), dtype, -bound2, bound2)
    return w1, b1, w2, b2


# TODO(synk): the real Petals AutoDistributedModelForCausalLM (remote P2P
# transformer over INITIAL_PEERS) has no Pallas equivalent; a deterministic
# embedding + lm_head stub stands in for it.  Its lm_head matmul is pre-fused
# (lm_head @ W1) into the adapter so the [M, V] logits never exist in HBM.
def fake_base_model(key, vocab_size, d_model=128, dtype=jnp.float32):
    k_emb, k_head = jax.random.split(key)
    emb = jax.random.normal(k_emb, (vocab_size, d_model), dtype) * 0.02
    lm_head = jax.random.normal(k_head, (d_model, vocab_size), dtype) * 0.02
    return emb, lm_head


def custom_adapter_forward(input_ids, emb, lm_head, adapter_params):
    hidden = emb[input_ids]                      # [B, S, D] (base-model stub)
    w1, b1, w2, b2 = adapter_params
    return fused_adapter_forward(hidden, lm_head, w1, b1, w2, b2)


if __name__ == "__main__":
    key = jax.random.PRNGKey(0)
    k_ids, k_base, k_adapter = jax.random.split(key, 3)

    # Small synthetic shapes: batch=2, seq=8, vocab=256, d_model=128, adapter H=32.
    B, S, V, H, D = 2, 8, 256, 32, 128
    input_ids = jax.random.randint(k_ids, (B, S), 0, V, dtype=jnp.int32)

    emb, lm_head = fake_base_model(k_base, V, D)
    adapter_params = init_adapter_params(k_adapter, V, H)

    out = custom_adapter_forward(input_ids, emb, lm_head, adapter_params)
    out = jax.block_until_ready(out)
    assert out.shape == (B, S, V), out.shape

    # Pure-JAX f32 reference for the whole forward pass (unfused formulation).
    w1, b1, w2, b2 = adapter_params
    hidden = emb[input_ids]
    logits = hidden.reshape(-1, D) @ lm_head
    ref = (jnp.maximum(logits @ w1 + b1, 0.0) @ w2 + b2).reshape(B, S, V)

    out_f32 = out.astype(jnp.float32)
    # bf16 operands/output (f32 accumulation inside) + pre-fused lm_head@W1
    # rounding -> relaxed tolerance.
    max_err = float(jnp.max(jnp.abs(out_f32 - ref)))
    assert jnp.allclose(out_f32, ref, atol=2e-2, rtol=2e-2), max_err

    print("KERNEL_OK")
</pallas_src>

<mosaic_0001>
module attributes {stable_mosaic.version = 11 : i64} {
  func.func @fused_adapter_kernel(%arg0: i32, %arg1: i32, %arg2: memref<16x128xbf16, #tpu.memory_space<vmem>>, %arg3: memref<128x32xbf16, #tpu.memory_space<vmem>>, %arg4: memref<1x32xf32, #tpu.memory_space<vmem>>, %arg5: memref<32x256xbf16, #tpu.memory_space<vmem>>, %arg6: memref<1x256xf32, #tpu.memory_space<vmem>>, %arg7: memref<16x256xbf16, #tpu.memory_space<vmem>>, %arg8: memref<16x32xbf16, #tpu.memory_space<vmem>>) attributes {dimension_semantics = [#tpu.dimension_semantics<parallel>, #tpu.dimension_semantics<arbitrary>], iteration_bounds = array<i64: 1, 1>, scalar_prefetch = 0 : i64, scratch_operands = 1 : i64, tpu.core_type = #tpu.core_type<tc>, window_params = [{transform_indices = @transform_0, window_bounds = array<i64: 16, 128>}, {pipeline_mode = #tpu.pipeline_mode<synchronous>, transform_indices = @transform_1, window_bounds = array<i64: 128, 32>}, {pipeline_mode = #tpu.pipeline_mode<synchronous>, transform_indices = @transform_2, window_bounds = array<i64: 1, 32>}, {transform_indices = @transform_3, window_bounds = array<i64: 32, 256>}, {transform_indices = @transform_4, window_bounds = array<i64: 1, 256>}, {transform_indices = @transform_5, window_bounds = array<i64: 16, 256>}]} {
    %c0_i32 = arith.constant 0 : i32
    %0 = arith.cmpi eq, %arg1, %c0_i32 : i32
    %1 = arith.extui %0 : i1 to i32
    %c0_i32_0 = arith.constant 0 : i32
    %2 = arith.cmpi ne, %1, %c0_i32_0 : i32
    scf.if %2 {
      %c0_8 = arith.constant 0 : index
      %c0_9 = arith.constant 0 : index
      %11 = vector.load %arg2[%c0_8, %c0_9] : memref<16x128xbf16, #tpu.memory_space<vmem>>, vector<16x128xbf16>
      %c0_10 = arith.constant 0 : index
      %c0_11 = arith.constant 0 : index
      %12 = vector.load %arg3[%c0_10, %c0_11] : memref<128x32xbf16, #tpu.memory_space<vmem>>, vector<128x32xbf16>
      %cst_12 = arith.constant dense<0.000000e+00> : vector<16x32xf32>
      %13 = tpu.matmul %11, %12, %cst_12 {dimension_numbers = #tpu.dot_dimension_numbers<[1], [0], [0], [1], [0, 0, 1, 1], [], []>} : vector<16x128xbf16>, vector<128x32xbf16>, vector<16x32xf32> -> vector<16x32xf32>
      %c0_13 = arith.constant 0 : index
      %c0_14 = arith.constant 0 : index
      %14 = vector.load %arg4[%c0_13, %c0_14] : memref<1x32xf32, #tpu.memory_space<vmem>>, vector<1x32xf32>
      %15 = vector.broadcast %14 : vector<1x32xf32> to vector<16x32xf32>
      %16 = arith.addf %13, %15 : vector<16x32xf32>
      %cst_15 = arith.constant 0.000000e+00 : f32
      %17 = vector.broadcast %cst_15 : f32 to vector<16x32xf32>
      %18 = arith.maximumf %16, %17 : vector<16x32xf32>
      %19 = arith.truncf %18 : vector<16x32xf32> to vector<16x32xbf16>
      %c0_16 = arith.constant 0 : index
      %c0_17 = arith.constant 0 : index
      %20 = vector.load %arg8[%c0_16, %c0_17] : memref<16x32xbf16, #tpu.memory_space<vmem>>, vector<16x32xbf16>
      tpu.vector_store %arg8[%c0_16, %c0_17], %19 {strides = array<i32>} : memref<16x32xbf16, #tpu.memory_space<vmem>>, vector<16x32xbf16>,
    } else {
    }
    %c0 = arith.constant 0 : index
    %c0_1 = arith.constant 0 : index
    %3 = vector.load %arg8[%c0, %c0_1] : memref<16x32xbf16, #tpu.memory_space<vmem>>, vector<16x32xbf16>
    %c0_2 = arith.constant 0 : index
    %c0_3 = arith.constant 0 : index
    %4 = vector.load %arg5[%c0_2, %c0_3] : memref<32x256xbf16, #tpu.memory_space<vmem>>, vector<32x256xbf16>
    %cst = arith.constant dense<0.000000e+00> : vector<16x256xf32>
    %5 = tpu.matmul %3, %4, %cst {dimension_numbers = #tpu.dot_dimension_numbers<[1], [0], [0], [1], [0, 0, 1, 1], [], []>} : vector<16x32xbf16>, vector<32x256xbf16>, vector<16x256xf32> -> vector<16x256xf32>
    %c0_4 = arith.constant 0 : index
    %c0_5 = arith.constant 0 : index
    %6 = vector.load %arg6[%c0_4, %c0_5] : memref<1x256xf32, #tpu.memory_space<vmem>>, vector<1x256xf32>
    %7 = vector.broadcast %6 : vector<1x256xf32> to vector<16x256xf32>
    %8 = arith.addf %5, %7 : vector<16x256xf32>
    %9 = arith.truncf %8 : vector<16x256xf32> to vector<16x256xbf16>
    %c0_6 = arith.constant 0 : index
    %c0_7 = arith.constant 0 : index
    %10 = vector.load %arg7[%c0_6, %c0_7] : memref<16x256xbf16, #tpu.memory_space<vmem>>, vector<16x256xbf16>
    tpu.vector_store %arg7[%c0_6, %c0_7], %9 {strides = array<i32>} : memref<16x256xbf16, #tpu.memory_space<vmem>>, vector<16x256xbf16>,
    return
  }
  func.func @transform_0(%arg0: i32, %arg1: i32) -> (i32, i32) {
    %c0_i32 = arith.constant 0 : i32
    %c0_i32_0 = arith.constant 0 : i32
    return %arg0, %c0_i32 : i32, i32
  }
  func.func @transform_1(%arg0: i32, %arg1: i32) -> (i32, i32) {
    %c0_i32 = arith.constant 0 : i32
    %c0_i32_0 = arith.constant 0 : i32
    %c0_i32_1 = arith.constant 0 : i32
    return %c0_i32, %c0_i32_0 : i32, i32
  }
  func.func @transform_2(%arg0: i32, %arg1: i32) -> (i32, i32) {
    %c0_i32 = arith.constant 0 : i32
    %c0_i32_0 = arith.constant 0 : i32
    %c0_i32_1 = arith.constant 0 : i32
    return %c0_i32, %c0_i32_0 : i32, i32
  }
  func.func @transform_3(%arg0: i32, %arg1: i32) -> (i32, i32) {
    %c0_i32 = arith.constant 0 : i32
    %c0_i32_0 = arith.constant 0 : i32
    return %c0_i32, %arg1 : i32, i32
  }
  func.func @transform_4(%arg0: i32, %arg1: i32) -> (i32, i32) {
    %c0_i32 = arith.constant 0 : i32
    %c0_i32_0 = arith.constant 0 : i32
    return %c0_i32, %arg1 : i32, i32
  }
  func.func @transform_5(%arg0: i32, %arg1: i32) -> (i32, i32) {
    %c0_i32 = arith.constant 0 : i32
    return %arg0, %arg1 : i32, i32
  }
}

</mosaic_0001>

<bundles_post_ra>
// kernel: tpu_custom_call.1
= control target key start
LH: loop header
LB: loop body
LE: loop exit
PB: predicated region body
PF: predicated region fallthrough
CT: control target
= control target key end

     0   :  { %v376_v1 = vmov 0.0   ;;  %vm377_vm0 = vmmov 0   ;;  %s460_s0 = inlined_call_operand.vmem [shape: bf16[16,128], index: 0, kind: input, shape index: {}]   ;;  %s461_s1 = inlined_call_operand.vmem [shape: bf16[128,32], index: 1, kind: input, shape index: {}]   ;;  %s462_s2 = inlined_call_operand.vmem [shape: f32[1,32], index: 2, kind: input, shape index: {}]   ;;  %s463_s3 = inlined_call_operand.vmem [shape: bf16[32,256], index: 3, kind: input, shape index: {}]   ;;  %s464_s4 = inlined_call_operand.vmem [shape: f32[1,256], index: 4, kind: input, shape index: {}]   ;;  %s465_s5 = inlined_call_operand.hbm [shape: bf16[16,256], index: 5, kind: output, shape index: {}]  }
   0x1   :  { %v338_v0 = vld [vmem:[%s461_s1 + $0x38] sm:$0xff]   ;;  %312 = vmatprep.subr.bf16.mxu0 %v376_v1  ;;  %v339_v2 = vld [vmem:[%s461_s1 + $0x30] sm:$0xff]   ;;  %328 = vmatprep.mubr.msk.bf16.mxu0 %vm377_vm0, %v376_v1  ;;  %v340_v3 = vld [vmem:[%s461_s1 + $0x28] sm:$0xff]  }
   0x2   :  { %313 = vmatpush3.bf16.msra.mxu0 %v338_v0  ;;  %v341_v4 = vld [vmem:[%s461_s1 + $0x20] sm:$0xff]  }
   0x3   :  { %314 = vmatprep.subr.bf16.mxu0 %v376_v1 }
   0x6   :  { %315 = vmatpush3.bf16.msra.mxu0 %v339_v2 }
   0x7   :  { %316 = vmatprep.subr.bf16.mxu0 %v376_v1 }
   0xa   :  { %317 = vmatpush3.bf16.msra.mxu0 %v340_v3 }
   0xb   :  { %10 = vsyncpa [#allocation4], 0  ;;  %318 = vmatprep.subr.bf16.mxu0 %v376_v1  ;;  %v342_v5 = vld [vmem:[%s461_s1 + $0x18] sm:$0xff]   ;;  %v343_v6 = vld [vmem:[%s461_s1 + $0x10] sm:$0xff]   ;;  %v378_v14 = vmov 0   ;;  %vm156_vm1 = vcmask 257024   ;;  %v167_v27 = vlaneseq }
   0xc   :  { %v344_v7 = vld [vmem:[%s461_s1 + $0x8] sm:$0xff]   ;;  %v345_v8 = vld [vmem:[%s461_s1] sm:$0xff]   ;;  %v347_v10 = vld [vmem:[%s463_s3 + $0x14] ss:$8 sps:$4 sm:$0xff]   ;;  %238 = vmatprep.mubr.bf16.mxu1 %v378_v14  ;;  %vm202_vm2 = vcmask 261120   ;;  %s379_s19 = smov [#allocation3]  }
   0xd   :  { %v346_v9 = vld [vmem:[%s460_s0] sm:$0xff]   ;;  %v349_v11 = vld [vmem:[%s463_s3 + $0x10] ss:$8 sps:$4 sm:$0xff]   ;;  %218 = vmatprep.subr.bf16.mxu1 %v347_v10  ;;  %v168_v28 = vshrl.u32 %v167_v27, 7  ;;  %s268_s20 = sshll.u32 %s379_s19, 4  ;;  %s269_s20 = int_to_ptr.vmem [resolvable:$true] %s268_s20 }
   0xe   :  { %319 = vmatpush3.bf16.msra.mxu0 %v341_v4  ;;  %v350_v12 = vld [vmem:[%s463_s3 + $0x4] ss:$8 sps:$4 sm:$0xff]   ;;  %219 = vmatpush1.bf16.msra.mxu1 %v349_v11  ;;  %v352_v13 = vld [vmem:[%s463_s3] ss:$8 sps:$4 sm:$0xff]   ;;  %s354_s21 = scalar_lea.vmem %s269_s20, 256  ;;  %p359_p1 = scmp.lt.s32.totalorder %s269_s20, %s269_s20 }
   0xf   :  { %320 = vmatprep.subr.bf16.mxu0 %v376_v1  ;;  %220 = vmatprep.subr.bf16.mxu1 %v350_v12  ;;  %v279_v15 = vld [vmem:[%s462_s2] ss:$0 sm:$0xff]  ;;  %v169_v29 = vsub.s32 0, %v168_v28  ;;  %v173_v30 = vsub.s32 1, %v168_v28  ;;  %p355_p0 = scmp.ne.s32.totalorder %s269_s20, %s354_s21  ;;  %p360_p2 = scmp.lt.s32.totalorder %s354_s21, %s354_s21 }
  0x10   :  { %v165_v31 = vld [vmem:[%s464_s4] sm:$0x3] }
  0x11   :  { %v170_v32 = vrot.slane %v165_v31, %v169_v29  ;;  %v174_v33 = vrot.slane %v165_v31, %v173_v30  ;;  %p361_p3 = por %p360_p2, %p359_p1 }
  0x12   :  { %321 = vmatpush3.bf16.msra.mxu0 %v342_v5  ;;  %221 = vmatpush1.bf16.msra.mxu1 %v352_v13 }
  0x13   :  { %322 = vmatprep.subr.bf16.mxu0 %v376_v1  ;;  %p362_p4 = pnand %p361_p3, %p355_p0 }
  0x16   :  { %323 = vmatpush3.bf16.msra.mxu0 %v343_v6 }
  0x17   :  { %324 = vmatprep.subr.bf16.mxu0 %v376_v1 }
  0x1a   :  { %325 = vmatpush3.bf16.msra.mxu0 %v344_v7 }
  0x1b   :  { %326 = vmatprep.subr.bf16.mxu0 %v376_v1 }
  0x1e   :  { %327 = vmatpush3.bf16.msra.mxu0 %v345_v8 }
  0x21   :  { %329 = vmatmul.mubr.bf16.vlgmr.msra.gmra.mxu0 %v346_v9 }
  0xe1   :  { %v139_v16 = vpop.f32.mrf.mxu0 }
  0xe2   :  { %v140_v17 = vadd.f32 %v279_v15, %v139_v16 }
  0xe3   :  { %v330_v18 = vpop.f32.mrf.mxu0 }
  0xe4   :  { %v146_v19 = vmax.f32 %v140_v17, 0.0 }
  0xe5   :  { %v142_v20 = vpop.f32.mrf.mxu0 }
  0xe6   :  { %v299_v21 = vpack.c.bf16 %v146_v19, %v146_v19  ;;  %v143_v22 = vadd.f32 %v279_v15, %v142_v20 }
  0xe7   :  { %v331_v23 = vpop.f32.mrf.mxu0 }
  0xe8   :  { %157 = vst.msk [vmem:[#allocation2] sm:$0xf] %vm156_vm1, %v299_v21  ;;  %v147_v24 = vmax.f32 %v143_v22, 0.0 }
  0xea   :  { %v300_v25 = vpack.c.bf16 %v147_v24, %v147_v24 }
  0xec   :  { %158 = vst.msk [vmem:[#allocation2 + $0x4] sm:$0xf] %vm156_vm1, %v300_v25 }
  0xf3   :  { %v353_v26 = vld [vmem:[#allocation2] sm:$0xff]  }
  0xf4   :  { %296 = vmatmul.mubr.msk.bf16.vlgmr.msra.gmra.mxu1 %vm202_vm2, %v353_v26 }
 0x1b4   :  { %v240_v34 = vpop.f32.mrf.mxu1 }
 0x1b5   :  { %v241_v36 = vadd.f32 %v240_v34, %v170_v32 }
 0x1b6   :  { %v242_v35 = vpop.f32.mrf.mxu1 }
 0x1b7   :  { %v243_v37 = vadd.f32 %v242_v35, %v174_v33 }
 0x1b8   :  { %v244_v38 = vpop.f32.mrf.mxu1 }
 0x1b9   :  { %v301_v39 = vpack.c.bf16 %v243_v37, %v241_v36  ;;  %v245_v41 = vadd.f32 %v244_v38, %v170_v32 }
 0x1ba   :  { %v246_v40 = vpop.f32.mrf.mxu1 }
 0x1bb   :  { %261 = vst [vmem:[#allocation3] sm:$0xff] %v301_v39  ;;  %v247_v42 = vadd.f32 %v246_v40, %v174_v33 }
 0x1bd   :  { %v302_v43 = vpack.c.bf16 %v247_v42, %v245_v41 }
 0x1bf   :  { %262 = vst [vmem:[#allocation3 + $0x8] sm:$0xff] %v302_v43 }
 0x1c0   :  { %365 = shalt.err (!%p362_p4)
}
 0x1c1   :  { %s380_s4 = smov 128   ;;  %s381_s22 = smov 8  }
 0x1c2   :  { %274 = dma.vmem_to_hbm [thread:$0]  %s269_s20, 256, %s465_s5, [#allocation4], %s380_s4, %s380_s4, %s381_s22  }
 0x1c3   :  { %374 = dma.done.wait [#allocation4], 256  }
 0x1c4   :  { %375 = vsyncadd [#allocation4], 4294967040 }
 0x1c5   :  { %278 = vsyncpa [#allocation4], 1 }

</bundles_post_ra>
